<compile_context>
chip_gen: v7x
topology: tpu7x:2x2x1
jax: 0.10.0
libtpu: 0.0.40
codegen_flags: <defaults>
</compile_context>

<pallas_src>
import functools

import jax
import jax.numpy as jnp
import numpy as np
from jax.experimental import pallas as pl
from jax.experimental.pallas import tpu as pltpu


_LANES = 128
_SUBLANES = 8
_MAX_BLOCK_ROWS = 4096  # (4096, 128) f32 block = 2 MiB per pipeline buffer.


def _qloss_kernel(q_ref, x_ref, t_ref, *out_refs, use_square, y_norm, rows,
                  block_rows, inner_steps, ragged):
    loss_out = out_refs[0]
    tgt_out = out_refs[1] if y_norm else None

    i = pl.program_id(1)  # inner ("arbitrary") axis

    @pl.when(i == 0)
    def _():
        loss_out[...] = jnp.zeros_like(loss_out)
        if y_norm:
            tgt_out[...] = jnp.zeros_like(tgt_out)

    q = q_ref[0, 0]
    x = x_ref[...].astype(jnp.float32)
    t = t_ref[...].astype(jnp.float32)
    if use_square:
        x = x * x
    diff = x - t
    # q*max(-diff,0) + (1-q)*max(diff,0)  ==  diff * where(diff>0, 1-q, -q)
    loss = diff * jnp.where(diff > 0, 1.0 - q, -q)

    def _accumulate(l, tv):
        # (block_rows,128) -> (block_rows//8, 8, 128) is a layout-preserving
        # split of the sublane axis; sum(axis=0) is vreg-wise VPU adds into a
        # single (8,128) partial held in the resident output block.
        loss_out[...] += l.reshape(-1, _SUBLANES, _LANES).sum(axis=0)
        if y_norm:
            tgt_out[...] += tv.reshape(-1, _SUBLANES, _LANES).sum(axis=0)

    if ragged:
        c = pl.program_id(0)
        g = c * inner_steps + i            # global (unclamped) block index
        block_end = (g + 1) * block_rows

        @pl.when(block_end <= rows)        # fully in-bounds: no mask cost
        def _():
            _accumulate(loss, t)

        @pl.when(block_end > rows)         # ragged / pad block: mask rows
        def _():
            row_ids = g * block_rows + jax.lax.broadcasted_iota(
                jnp.int32, (block_rows, 1), 0)
            valid = row_ids < rows
            _accumulate(jnp.where(valid, loss, 0.0),
                        jnp.where(valid, t, 0.0) if y_norm else t)
    else:
        _accumulate(loss, t)


def quantile_loss(inp, target, quantile, *, y_norm=True, size_average=True,
                  use_square=True):
    """Pallas-TPU equivalent of QauntileLoss.forward(input, target, quantile)."""
    assert inp.shape == target.shape, "input/target must share a shape"
    n_elem = int(inp.size)
    q32 = jnp.asarray(quantile, jnp.float32)

    x_flat = inp.reshape(-1)
    t_flat = target.reshape(-1)

    aligned_rows = n_elem // _LANES
    loss_sum = jnp.float32(0.0)
    tgt_sum = jnp.float32(0.0)

    kernel_elems = 0
    if aligned_rows >= _SUBLANES:
        # Largest multiple of 8 rows that fits, capped (v5e-safe default VMEM).
        block_rows = min(_MAX_BLOCK_ROWS, (aligned_rows // _SUBLANES) * _SUBLANES)
        nb = -(-aligned_rows // block_rows)        # total row-blocks
        num_splits = 2 if nb >= 2 else 1           # v7x: 2 TCs; 1-TC: serial, ~free
        inner = -(-nb // num_splits)
        padded = (num_splits * inner) != nb        # pad step exists (odd nb)
        ragged = (num_splits * inner * block_rows) != aligned_rows

        kernel_elems = aligned_rows * _LANES
        x2d = (x_flat if kernel_elems == n_elem else x_flat[:kernel_elems])
        x2d = x2d.reshape(aligned_rows, _LANES)
        t2d = (t_flat if kernel_elems == n_elem else t_flat[:kernel_elems])
        t2d = t2d.reshape(aligned_rows, _LANES)
        q2d = q32.reshape(1, 1)

        last_block = nb - 1

        def data_map(c, i):
            g = c * inner + i
            if padded:
                # Clamp pad steps to the last real block; their contribution is
                # masked to zero in-kernel and the duplicate DMA is elided
                # (same block index as the previous step on that core).
                g = jnp.minimum(g, last_block)
            return (g, 0)

        part_shape = jax.ShapeDtypeStruct((num_splits * _SUBLANES, _LANES),
                                          jnp.float32)
        part_spec = pl.BlockSpec((_SUBLANES, _LANES), lambda c, i: (c, 0))
        if y_norm:
            out_shape = (part_shape, part_shape)
            out_specs = (part_spec, part_spec)
        else:
            out_shape = part_shape
            out_specs = part_spec

        kernel = functools.partial(
            _qloss_kernel, use_square=use_square, y_norm=y_norm,
            rows=aligned_rows, block_rows=block_rows, inner_steps=inner,
            ragged=ragged)

        in_bytes = np.dtype(inp.dtype).itemsize + np.dtype(target.dtype).itemsize
        cost = pl.CostEstimate(
            flops=6 * kernel_elems,
            transcendentals=0,
            bytes_accessed=kernel_elems * in_bytes)

        res = pl.pallas_call(
            kernel,
            out_shape=out_shape,
            grid_spec=pltpu.PrefetchScalarGridSpec(
                num_scalar_prefetch=0,
                grid=(num_splits, inner),
                in_specs=[
                    pl.BlockSpec((1, 1), lambda c, i: (0, 0),
                                 memory_space=pltpu.SMEM),          # quantile
                    pl.BlockSpec((block_rows, _LANES), data_map),    # input
                    pl.BlockSpec((block_rows, _LANES), data_map),    # target
                ],
                out_specs=out_specs,
            ),
            compiler_params=pltpu.CompilerParams(
                dimension_semantics=("parallel", "arbitrary")),
            cost_estimate=cost,
        )(q2d, x2d, t2d)

        if y_norm:
            loss_part, tgt_part = res
            tgt_sum = tgt_sum + jnp.sum(tgt_part)
        else:
            loss_part = res
        loss_sum = loss_sum + jnp.sum(loss_part)

    if kernel_elems < n_elem:
        # Tail the kernel did not cover: < 128 elements when a kernel ran,
        # or the whole (tiny, < 1024-element) tensor otherwise.
        xt = x_flat[kernel_elems:].astype(jnp.float32)
        tt = t_flat[kernel_elems:].astype(jnp.float32)
        if use_square:
            xt = xt * xt
        d = xt - tt
        loss_sum = loss_sum + jnp.sum(d * jnp.where(d > 0, 1.0 - q32, -q32))
        if y_norm:
            tgt_sum = tgt_sum + jnp.sum(tt)

    if y_norm:
        loss_sum = loss_sum / jnp.maximum(jnp.float32(1.0), tgt_sum)
    if size_average:
        return loss_sum / jnp.float32(n_elem)
    return loss_sum


def _reference_f64(inp, target, quantile, *, y_norm=True, size_average=True,
                   use_square=True):
    """Float64 numpy reference matching the PyTorch module semantics."""
    x = np.asarray(inp, dtype=np.float64)
    t = np.asarray(target, dtype=np.float64)
    if use_square:
        x = x ** 2
    diff = x - t
    loss = quantile * np.maximum(-diff, 0.0) + (1.0 - quantile) * np.maximum(diff, 0.0)
    if y_norm:
        loss = loss / max(1.0, float(t.sum()))
    return float(loss.mean() if size_average else loss.sum())


if __name__ == "__main__":
    key = jax.random.PRNGKey(0)
    k1, k2, k3, k4, k5, k6 = jax.random.split(key, 6)

    # Case 1: small NCHW input (batch=2, channels=4, spatial=16x16),
    # lane-aligned, single block, default flags.
    inp1 = jax.random.normal(k1, (2, 4, 16, 16), dtype=jnp.float32)
    tgt1 = jax.random.uniform(k2, (2, 4, 16, 16), dtype=jnp.float32,
                              minval=0.0, maxval=2.0)
    out1 = jax.block_until_ready(quantile_loss(inp1, tgt1, 0.7))
    ref1 = _reference_f64(np.asarray(inp1), np.asarray(tgt1), 0.7)
    assert np.allclose(float(out1), ref1, rtol=1e-4, atol=1e-7), (float(out1), ref1)

    # Case 2: larger aligned input, single big block, size_average=False path.
    inp2 = jax.random.normal(k3, (4, 8, 96, 96), dtype=jnp.float32)
    tgt2 = jax.random.uniform(k4, (4, 8, 96, 96), dtype=jnp.float32,
                              minval=0.0, maxval=2.0)
    out2 = jax.block_until_ready(
        quantile_loss(inp2, tgt2, 0.3, size_average=False))
    ref2 = _reference_f64(np.asarray(inp2), np.asarray(tgt2), 0.3,
                          size_average=False)
    assert np.allclose(float(out2), ref2, rtol=1e-4, atol=1e-7), (float(out2), ref2)

    # Case 3: non-lane-aligned numel -> 2-way parallel split, masked ragged
    # block in-kernel, tiny plain-JAX tail; y_norm=False (single output) path.
    inp3 = jax.random.normal(k5, (3, 5, 7, 11), dtype=jnp.float32)
    tgt3 = jax.random.uniform(k6, (3, 5, 7, 11), dtype=jnp.float32,
                              minval=0.0, maxval=2.0)
    out3 = jax.block_until_ready(quantile_loss(inp3, tgt3, 0.5, y_norm=False))
    ref3 = _reference_f64(np.asarray(inp3), np.asarray(tgt3), 0.5, y_norm=False)
    assert np.allclose(float(out3), ref3, rtol=1e-4, atol=1e-6), (float(out3), ref3)

    print("KERNEL_OK")
</pallas_src>

<mosaic_0001>
module attributes {stable_mosaic.version = 11 : i64} {
  func.func @_qloss_kernel(%arg0: i32, %arg1: i32, %arg2: memref<1x1xf32, #tpu.memory_space<smem>>, %arg3: memref<16x128xf32, #tpu.memory_space<vmem>>, %arg4: memref<16x128xf32, #tpu.memory_space<vmem>>, %arg5: memref<8x128xf32, #tpu.memory_space<vmem>>, %arg6: memref<8x128xf32, #tpu.memory_space<vmem>>) attributes {dimension_semantics = [#tpu.dimension_semantics<parallel>, #tpu.dimension_semantics<arbitrary>], iteration_bounds = array<i64: 1, 1>, scalar_prefetch = 0 : i64, scratch_operands = 0 : i64, tpu.core_type = #tpu.core_type<tc>, window_params = [{transform_indices = @transform_0, window_bounds = array<i64: 1, 1>}, {transform_indices = @transform_1, window_bounds = array<i64: 16, 128>}, {transform_indices = @transform_2, window_bounds = array<i64: 16, 128>}, {transform_indices = @transform_3, window_bounds = array<i64: 8, 128>}, {transform_indices = @transform_4, window_bounds = array<i64: 8, 128>}]} {
    %c0_i32 = arith.constant 0 : i32
    %0 = arith.cmpi eq, %arg1, %c0_i32 : i32
    %1 = arith.extui %0 : i1 to i32
    %c0_i32_0 = arith.constant 0 : i32
    %2 = arith.cmpi ne, %1, %c0_i32_0 : i32
    scf.if %2 {
      %cst_18 = arith.constant 0.000000e+00 : f32
      %26 = vector.broadcast %cst_18 : f32 to vector<8x128xf32>
      %c0_19 = arith.constant 0 : index
      %c0_20 = arith.constant 0 : index
      %27 = vector.load %arg5[%c0_19, %c0_20] : memref<8x128xf32, #tpu.memory_space<vmem>>, vector<8x128xf32>
      tpu.vector_store %arg5[%c0_19, %c0_20], %26 {strides = array<i32>} : memref<8x128xf32, #tpu.memory_space<vmem>>, vector<8x128xf32>,
      %cst_21 = arith.constant 0.000000e+00 : f32
      %28 = vector.broadcast %cst_21 : f32 to vector<8x128xf32>
      %c0_22 = arith.constant 0 : index
      %c0_23 = arith.constant 0 : index
      %29 = vector.load %arg6[%c0_22, %c0_23] : memref<8x128xf32, #tpu.memory_space<vmem>>, vector<8x128xf32>
      tpu.vector_store %arg6[%c0_22, %c0_23], %28 {strides = array<i32>} : memref<8x128xf32, #tpu.memory_space<vmem>>, vector<8x128xf32>,
    } else {
    }
    %c0 = arith.constant 0 : index
    %c0_1 = arith.constant 0 : index
    %3 = memref.load %arg2[%c0, %c0_1] : memref<1x1xf32, #tpu.memory_space<smem>>
    %c0_2 = arith.constant 0 : index
    %c0_3 = arith.constant 0 : index
    %4 = vector.load %arg3[%c0_2, %c0_3] : memref<16x128xf32, #tpu.memory_space<vmem>>, vector<16x128xf32>
    %c0_4 = arith.constant 0 : index
    %c0_5 = arith.constant 0 : index
    %5 = vector.load %arg4[%c0_4, %c0_5] : memref<16x128xf32, #tpu.memory_space<vmem>>, vector<16x128xf32>
    %6 = arith.mulf %4, %4 : vector<16x128xf32>
    %7 = arith.subf %6, %5 : vector<16x128xf32>
    %cst = arith.constant 0.000000e+00 : f32
    %8 = vector.broadcast %cst : f32 to vector<16x128xf32>
    %9 = arith.cmpf ogt, %7, %8 : vector<16x128xf32>
    %cst_6 = arith.constant 1.000000e+00 : f32
    %10 = arith.subf %cst_6, %3 : f32
    %cst_7 = arith.constant 0.000000e+00 : f32
    %11 = arith.subf %cst_7, %3 : f32
    %12 = vector.broadcast %10 : f32 to vector<16x128xf32>
    %13 = vector.broadcast %11 : f32 to vector<16x128xf32>
    %14 = arith.select %9, %12, %13 : vector<16x128xi1>, vector<16x128xf32>
    %15 = arith.mulf %7, %14 : vector<16x128xf32>
    %c0_8 = arith.constant 0 : index
    %c0_9 = arith.constant 0 : index
    %16 = vector.load %arg5[%c0_8, %c0_9] : memref<8x128xf32, #tpu.memory_space<vmem>>, vector<8x128xf32>
    %17 = vector.shape_cast %15 : vector<16x128xf32> to vector<2x8x128xf32>
    %cst_10 = arith.constant dense<0.000000e+00> : vector<8x128xf32>
    %18 = vector.multi_reduction <add>, %17, %cst_10 [0] : vector<2x8x128xf32> to vector<8x128xf32>
    %19 = arith.addf %16, %18 : vector<8x128xf32>
    %c0_11 = arith.constant 0 : index
    %c0_12 = arith.constant 0 : index
    %20 = vector.load %arg5[%c0_11, %c0_12] : memref<8x128xf32, #tpu.memory_space<vmem>>, vector<8x128xf32>
    tpu.vector_store %arg5[%c0_11, %c0_12], %19 {strides = array<i32>} : memref<8x128xf32, #tpu.memory_space<vmem>>, vector<8x128xf32>,
    %c0_13 = arith.constant 0 : index
    %c0_14 = arith.constant 0 : index
    %21 = vector.load %arg6[%c0_13, %c0_14] : memref<8x128xf32, #tpu.memory_space<vmem>>, vector<8x128xf32>
    %22 = vector.shape_cast %5 : vector<16x128xf32> to vector<2x8x128xf32>
    %cst_15 = arith.constant dense<0.000000e+00> : vector<8x128xf32>
    %23 = vector.multi_reduction <add>, %22, %cst_15 [0] : vector<2x8x128xf32> to vector<8x128xf32>
    %24 = arith.addf %21, %23 : vector<8x128xf32>
    %c0_16 = arith.constant 0 : index
    %c0_17 = arith.constant 0 : index
    %25 = vector.load %arg6[%c0_16, %c0_17] : memref<8x128xf32, #tpu.memory_space<vmem>>, vector<8x128xf32>
    tpu.vector_store %arg6[%c0_16, %c0_17], %24 {strides = array<i32>} : memref<8x128xf32, #tpu.memory_space<vmem>>, vector<8x128xf32>,
    return
  }
  func.func @transform_0(%arg0: i32, %arg1: i32) -> (i32, i32) {
    %c0_i32 = arith.constant 0 : i32
    %c0_i32_0 = arith.constant 0 : i32
    %c0_i32_1 = arith.constant 0 : i32
    return %c0_i32, %c0_i32_0 : i32, i32
  }
  func.func @transform_1(%arg0: i32, %arg1: i32) -> (i32, i32) {
    %c1_i32 = arith.constant 1 : i32
    %0 = arith.muli %arg0, %c1_i32 : i32
    %1 = arith.addi %0, %arg1 : i32
    %c0_i32 = arith.constant 0 : i32
    %c0_i32_0 = arith.constant 0 : i32
    return %1, %c0_i32 : i32, i32
  }
  func.func @transform_2(%arg0: i32, %arg1: i32) -> (i32, i32) {
    %c1_i32 = arith.constant 1 : i32
    %0 = arith.muli %arg0, %c1_i32 : i32
    %1 = arith.addi %0, %arg1 : i32
    %c0_i32 = arith.constant 0 : i32
    %c0_i32_0 = arith.constant 0 : i32
    return %1, %c0_i32 : i32, i32
  }
  func.func @transform_3(%arg0: i32, %arg1: i32) -> (i32, i32) {
    %c0_i32 = arith.constant 0 : i32
    %c0_i32_0 = arith.constant 0 : i32
    return %arg0, %c0_i32 : i32, i32
  }
  func.func @transform_4(%arg0: i32, %arg1: i32) -> (i32, i32) {
    %c0_i32 = arith.constant 0 : i32
    %c0_i32_0 = arith.constant 0 : i32
    return %arg0, %c0_i32 : i32, i32
  }
}

</mosaic_0001>

<bundles_post_ra>
// kernel: tpu_custom_call.1
= control target key start
LH: loop header
LB: loop body
LE: loop exit
PB: predicated region body
PF: predicated region fallthrough
CT: control target
= control target key end

     0   :  { %11 = vsyncpa [#allocation4], 0  ;;  %s310_s0 = inlined_call_operand.<no memory space> [shape: f32[1,1], index: 0, kind: input, shape index: {}]   ;;  %s311_s1 = inlined_call_operand.hbm [shape: f32[16,128], index: 1, kind: input, shape index: {}]   ;;  %s312_s2 = inlined_call_operand.hbm [shape: f32[16,128], index: 2, kind: input, shape index: {}]   ;;  %s313_s3 = inlined_call_operand.hbm [shape: f32[8,128], index: 3, kind: output, shape index: {0}]   ;;  %s314_s4 = inlined_call_operand.hbm [shape: f32[8,128], index: 4, kind: output, shape index: {1}]  }
   0x1   :  { %12 = vsyncpa [#allocation7], 0 }
   0x2   :  { %13 = vsyncpa [#allocation5], 0 }
   0x3   :  { %14 = vsyncpa [#allocation10], 0  ;;  %s225_s15 = smov [#allocation3]   ;;  %s129_s19 = scalar_lea.hbm %s311_s1, 256 }
   0x4   :  { %s26_s16 = sshll.u32 %s225_s15, 4  ;;  %p130_p0 = scmp.ne.s32.totalorder %s311_s1, %s129_s19  ;;  %s27_s16 = int_to_ptr.vmem [resolvable:$true] %s26_s16 }
   0x5   :  { %p133_p1 = scmp.lt.u32.totalorder %s129_s19, %s311_s1 }
   0x7   :  { %p135_p2 = pnand %p133_p1, %p130_p0 }
   0x9   :  { %138 = shalt.err (!%p135_p2)
}
   0xa   :  { %s139_s24 = scalar_lea.vmem %s27_s16, 256  ;;  %p144_p4 = scmp.lt.s32.totalorder %s27_s16, %s27_s16 }
   0xb   :  { %p140_p3 = scmp.ne.s32.totalorder %s27_s16, %s139_s24  ;;  %p145_p5 = scmp.lt.s32.totalorder %s139_s24, %s139_s24 }
   0xd   :  { %p146_p6 = por %p145_p5, %p144_p4 }
   0xf   :  { %p147_p7 = pnand %p146_p6, %p140_p3 }
  0x11   :  { %150 = shalt.err (!%p147_p7)
}
  0x12   :  { %s226_s25 = smov 128   ;;  %s227_s26 = smov 8  }
  0x13   :  { %32 = dma.hbm_to_vmem [thread:$0]  %s311_s1, 256, %s27_s16, [#allocation4], %s226_s25, %s226_s25, %s227_s26  }
  0x14   :  { %s228_s29 = smov [#allocation6]   ;;  %s151_s7 = scalar_lea.hbm %s312_s2, 256 }
  0x15   :  { %s42_s30 = sshll.u32 %s228_s29, 4  ;;  %p152_p8 = scmp.ne.s32.totalorder %s312_s2, %s151_s7  ;;  %s43_s30 = int_to_ptr.vmem [resolvable:$true] %s42_s30 }
  0x16   :  { %p155_p9 = scmp.lt.u32.totalorder %s151_s7, %s312_s2 }
  0x18   :  { %p157_p10 = pnand %p155_p9, %p152_p8 }
  0x1a   :  { %160 = shalt.err (!%p157_p10)
}
  0x1b   :  { %s161_s12 = scalar_lea.vmem %s43_s30, 256  ;;  %p166_p12 = scmp.lt.s32.totalorder %s43_s30, %s43_s30 }
  0x1c   :  { %p162_p11 = scmp.ne.s32.totalorder %s43_s30, %s161_s12  ;;  %p167_p13 = scmp.lt.s32.totalorder %s161_s12, %s161_s12 }
  0x1e   :  { %p168_p0 = por %p167_p13, %p166_p12 }
  0x20   :  { %p169_p1 = pnand %p168_p0, %p162_p11 }
  0x22   :  { %172 = shalt.err (!%p169_p1)
}
  0x23   :  { %48 = dma.hbm_to_vmem [thread:$0]  %s312_s2, 256, %s43_s30, [#allocation7], %s226_s25, %s226_s25, %s227_s26  }
  0x24   :  { %217 = dma.done.wait [#allocation4], 256  }
  0x25   :  { %218 = vsyncadd [#allocation4], 4294967040 }
  0x26   :  { %219 = dma.done.wait [#allocation7], 256  }
  0x27   :  { %220 = vsyncadd [#allocation7], 4294967040  ;;  %s76_s16 = ssub.f32 1.0, %s310_s0  ;;  %v66_v0 = vld [vmem:[#allocation3] sm:$0xff]  ;;  %v67_v1 = vld [vmem:[#allocation3 + $0x8] sm:$0xff]  ;;  %s229_s20 = smov [#allocation9]  }
  0x28   :  { %s77_s19 = ssub.f32 0.0, %s310_s0  ;;  %v68_v2 = vld [vmem:[#allocation6] sm:$0xff]  ;;  %v69_v3 = vld [vmem:[#allocation6 + $0x8] sm:$0xff]  ;;  %v70_v4 = vmul.f32 %v66_v0, %v66_v0  ;;  %v71_v5 = vmul.f32 %v67_v1, %v67_v1  ;;  %s108_s2 = sshll.u32 %s229_s20, 4  ;;  %s109_s2 = int_to_ptr.vmem [resolvable:$true] %s108_s2 }
  0x29   :  { %v89_v6 = vadd.f32 %v69_v3, %v68_v2  ;;  %v78_v9 = vstv %s76_s16  ;;  %s173_s0 = scalar_lea.vmem %s109_s2, 128  ;;  %p178_p3 = scmp.lt.s32.totalorder %s109_s2, %s109_s2 }
  0x2a   :  { %v72_v7 = vsub.f32 %v70_v4, %v68_v2  ;;  %v73_v8 = vsub.f32 %v71_v5, %v69_v3  ;;  %v79_v10 = vstv %s77_s19  ;;  %p174_p2 = scmp.ne.s32.totalorder %s109_s2, %s173_s0  ;;  %p179_p4 = scmp.lt.s32.totalorder %s173_s0, %s173_s0 }
  0x2b   :  { %91 = vst [vmem:[#allocation9] sm:$0xff] %v89_v6 }
  0x2c   :  { %vm74_vm0 = vcmp.gt.f32.partialorder %v72_v7, 0.0  ;;  %vm75_vm1 = vcmp.gt.f32.partialorder %v73_v8, 0.0  ;;  %p180_p5 = por %p179_p4, %p178_p3 }
  0x2d   :  { %v80_v11 = vsel %vm74_vm0, %v78_v9, %v79_v10  ;;  %v81_v12 = vsel %vm75_vm1, %v78_v9, %v79_v10 }
  0x2e   :  { %v82_v13 = vmul.f32 %v80_v11, %v72_v7  ;;  %v83_v14 = vmul.f32 %v81_v12, %v73_v8  ;;  %p181_p6 = pnand %p180_p5, %p174_p2 }
  0x30   :  { %184 = shalt.err (!%p181_p6)
}
  0x31   :  { %s185_s23 = scalar_lea.hbm %s314_s4, 128 }
  0x32   :  { %p186_p7 = scmp.ne.s32.totalorder %s314_s4, %s185_s23  ;;  %p189_p8 = scmp.lt.u32.totalorder %s185_s23, %s314_s4 }
  0x34   :  { %p191_p9 = pnand %p189_p8, %p186_p7 }
  0x36   :  { %194 = shalt.err (!%p191_p9)
}
  0x37   :  { %111 = dma.vmem_to_hbm [thread:$0]  %s109_s2, 128, %s314_s4, [#allocation10]   ;;  %v85_v15 = vadd.f32 %v83_v14, %v82_v13 }
  0x38   :  { %s230_s30 = smov [#allocation8]  }
  0x39   :  { %s98_s5 = sshll.u32 %s230_s30, 4  ;;  %87 = vst [vmem:[#allocation8] sm:$0xff] %v85_v15  ;;  %s99_s5 = int_to_ptr.vmem [resolvable:$true] %s98_s5 }
  0x3a   :  { %s195_s6 = scalar_lea.vmem %s99_s5, 128  ;;  %p200_p11 = scmp.lt.s32.totalorder %s99_s5, %s99_s5 }
  0x3b   :  { %p196_p10 = scmp.ne.s32.totalorder %s99_s5, %s195_s6  ;;  %p201_p12 = scmp.lt.s32.totalorder %s195_s6, %s195_s6 }
  0x3d   :  { %p202_p13 = por %p201_p12, %p200_p11 }
  0x3f   :  { %p203_p0 = pnand %p202_p13, %p196_p10 }
  0x41   :  { %206 = shalt.err (!%p203_p0)
}
  0x42   :  { %s207_s9 = scalar_lea.hbm %s313_s3, 128 }
  0x43   :  { %p208_p1 = scmp.ne.s32.totalorder %s313_s3, %s207_s9  ;;  %p211_p2 = scmp.lt.u32.totalorder %s207_s9, %s313_s3 }
  0x45   :  { %p213_p3 = pnand %p211_p2, %p208_p1 }
  0x47   :  { %216 = shalt.err (!%p213_p3)
}
  0x48   :  { %101 = dma.vmem_to_hbm [thread:$0]  %s99_s5, 128, %s313_s3, [#allocation5]  }
  0x49   :  { %221 = dma.done.wait [#allocation5], 128  }
  0x4a   :  { %222 = vsyncadd [#allocation5], 4294967168 }
  0x4b   :  { %223 = dma.done.wait [#allocation10], 128  }
  0x4c   :  { %224 = vsyncadd [#allocation10], 4294967168 }
  0x4d   :  { %118 = vsyncpa [#allocation4], 1 }
  0x4e   :  { %119 = vsyncpa [#allocation7], 1 }
  0x4f   :  { %120 = vsyncpa [#allocation5], 1 }
  0x50   :  { %121 = vsyncpa [#allocation10], 1 }

</bundles_post_ra>
